<compile_context>
chip_gen: v7x
topology: tpu7x:2x2x1
jax: 0.10.0
libtpu: 0.0.40
codegen_flags: <defaults>
</compile_context>

<pallas_src>
import jax
import jax.numpy as jnp
from jax.experimental import pallas as pl
from jax.experimental.pallas import tpu as pltpu


def _planter_kernel(x_ref, wt_ref, b_ref, o_ref):
    # x_ref : (1, N)   flattened observations, bf16
    # wt_ref: (N, T)   weight pre-transposed to (in, out), bf16 (T == N or a column tile)
    # b_ref : (1, T)   bias, f32
    # o_ref : (1, T)   {0., 1.} output, f32
    y = jnp.dot(x_ref[...], wt_ref[...], preferred_element_type=jnp.float32)
    y = y + b_ref[...]
    # round(sigmoid(y)) == (y > 0) exactly: sigmoid(y) > 0.5 iff y > 0, and
    # sigmoid(0) = 0.5 rounds to 0 under round-half-to-even (matches strict '>').
    o_ref[...] = jnp.where(y > 0, 1.0, 0.0).astype(o_ref.dtype)


def make_planter_params(weight, bias):
    """One-time parameter prep (hoisted out of the per-call path).

    weight: (N, N) in PyTorch (out_features, in_features) layout.
    Returns wt (N, N) bf16 in (in, out) layout and b (1, N) f32.
    """
    wt = jnp.asarray(weight, jnp.float32).T.astype(jnp.bfloat16)
    b = jnp.asarray(bias, jnp.float32).reshape(1, -1)
    return wt, b


def _choose_col_tile(N, weight_tile_budget_bytes=2 * 1024 * 1024):
    """Largest multiple of 128 dividing N whose double-buffered bf16 (N, tn) tile
    stays under the budget."""
    tn = 0
    for cand in range(128, N + 1, 128):
        if N % cand == 0 and 2 * N * cand * 2 <= weight_tile_budget_bytes:
            tn = cand
    return tn


def linear_planter_forward(observations, wt, b):
    """observations: (window_size, window_size); wt: (N, N) bf16 (in, out); b: (1, N) f32."""
    H, W = observations.shape
    N = H * W
    x = observations.reshape(1, N).astype(jnp.bfloat16)

    weight_bytes = N * N * 2  # bf16
    tn = _choose_col_tile(N) if weight_bytes > (4 * 1024 * 1024) else 0

    if tn == 0:
        # Small N (e.g. N=256): whole-array VMEM blocks, no grid, no pipelining overhead.
        out_flat = pl.pallas_call(
            _planter_kernel,
            out_shape=jax.ShapeDtypeStruct((1, N), jnp.float32),
            in_specs=[
                pl.BlockSpec(memory_space=pltpu.MemorySpace.VMEM),
                pl.BlockSpec(memory_space=pltpu.MemorySpace.VMEM),
                pl.BlockSpec(memory_space=pltpu.MemorySpace.VMEM),
            ],
            out_specs=pl.BlockSpec(memory_space=pltpu.MemorySpace.VMEM),
        )(x, wt, b)
    else:
        # Large N: tile the weight along the output-feature axis so the kernel never
        # needs the full (N, N) weight resident (keeps v7x's 64 MiB VMEM safe).
        out_flat = pl.pallas_call(
            _planter_kernel,
            out_shape=jax.ShapeDtypeStruct((1, N), jnp.float32),
            grid_spec=pltpu.PrefetchScalarGridSpec(
                num_scalar_prefetch=0,
                grid=(N // tn,),
                in_specs=[
                    pl.BlockSpec((1, N), lambda j: (0, 0)),    # x stays resident
                    pl.BlockSpec((N, tn), lambda j: (0, j)),   # weight column tile
                    pl.BlockSpec((1, tn), lambda j: (0, j)),
                ],
                out_specs=pl.BlockSpec((1, tn), lambda j: (0, j)),
            ),
            compiler_params=pltpu.CompilerParams(
                # Output tiles are independent -> shard across the 2 TCs on v7x.
                dimension_semantics=("parallel",),
            ),
        )(x, wt, b)

    # view(observations.shape[0], observations.shape[1])
    return out_flat.reshape(H, W)


if __name__ == "__main__":
    window_size = 16                      # N = 256 (lane-friendly multiple of 128/256)
    N = window_size * window_size

    key = jax.random.PRNGKey(0)
    k_obs, k_w, k_b = jax.random.split(key, 3)

    # Deterministic synthetic parameters (mimicking torch.nn.Linear's
    # U(-1/sqrt(in), 1/sqrt(in)) init).
    bound = 1.0 / jnp.sqrt(jnp.float32(N))
    weight = jax.random.uniform(k_w, (N, N), jnp.float32, minval=-bound, maxval=bound)
    bias = jax.random.uniform(k_b, (N,), jnp.float32, minval=-bound, maxval=bound)
    observations = jax.random.uniform(k_obs, (window_size, window_size), jnp.float32)

    # Parameter prep happens exactly once; the hot path only runs the kernel.
    wt, b = make_planter_params(weight, bias)

    fwd = jax.jit(linear_planter_forward)
    out = jax.block_until_ready(fwd(observations, wt, b))

    # Sanity: output shape matches observations.view(H, W) and values are {0., 1.}
    assert out.shape == (window_size, window_size)
    assert bool(jnp.all((out == 0.0) | (out == 1.0)))

    # Cross-check against a pure-JAX f32 reference of the original module.
    # bf16 inputs can only flip decisions where the pre-activation is ~0, so allow
    # mismatches exclusively in that measure-zero neighbourhood.
    y_ref = observations.reshape(-1) @ weight.T + bias
    ref = jnp.round(jax.nn.sigmoid(y_ref)).reshape(window_size, window_size)
    near_zero = (jnp.abs(y_ref) < 1e-2).reshape(window_size, window_size)
    assert bool(jnp.all((out == ref) | near_zero))

    print("KERNEL_OK")
</pallas_src>

<mosaic_0001>
module attributes {stable_mosaic.version = 11 : i64} {
  func.func @_planter_kernel(%arg0: memref<1x256xbf16, #tpu.memory_space<vmem>>, %arg1: memref<256x256xbf16, #tpu.memory_space<vmem>>, %arg2: memref<1x256xf32, #tpu.memory_space<vmem>>, %arg3: memref<1x256xf32, #tpu.memory_space<vmem>>) attributes {dimension_semantics = [], scalar_prefetch = 0 : i64, scratch_operands = 0 : i64, tpu.core_type = #tpu.core_type<tc>} {
    %c0 = arith.constant 0 : index
    %c0_0 = arith.constant 0 : index
    %0 = vector.load %arg0[%c0, %c0_0] : memref<1x256xbf16, #tpu.memory_space<vmem>>, vector<1x256xbf16>
    %c0_1 = arith.constant 0 : index
    %c0_2 = arith.constant 0 : index
    %1 = vector.load %arg1[%c0_1, %c0_2] : memref<256x256xbf16, #tpu.memory_space<vmem>>, vector<256x256xbf16>
    %cst = arith.constant dense<0.000000e+00> : vector<1x256xf32>
    %2 = tpu.matmul %0, %1, %cst {dimension_numbers = #tpu.dot_dimension_numbers<[1], [0], [0], [1], [0, 0, 1, 1], [], []>} : vector<1x256xbf16>, vector<256x256xbf16>, vector<1x256xf32> -> vector<1x256xf32>
    %c0_3 = arith.constant 0 : index
    %c0_4 = arith.constant 0 : index
    %3 = vector.load %arg2[%c0_3, %c0_4] : memref<1x256xf32, #tpu.memory_space<vmem>>, vector<1x256xf32>
    %4 = arith.addf %2, %3 : vector<1x256xf32>
    %cst_5 = arith.constant 0.000000e+00 : f32
    %5 = vector.broadcast %cst_5 : f32 to vector<1x256xf32>
    %6 = arith.cmpf ogt, %4, %5 : vector<1x256xf32>
    %cst_6 = arith.constant 1.000000e+00 : f32
    %cst_7 = arith.constant 0.000000e+00 : f32
    %7 = vector.broadcast %cst_6 : f32 to vector<1x256xf32>
    %8 = vector.broadcast %cst_7 : f32 to vector<1x256xf32>
    %9 = arith.select %6, %7, %8 : vector<1x256xi1>, vector<1x256xf32>
    %c0_8 = arith.constant 0 : index
    %c0_9 = arith.constant 0 : index
    %10 = vector.load %arg3[%c0_8, %c0_9] : memref<1x256xf32, #tpu.memory_space<vmem>>, vector<1x256xf32>
    tpu.vector_store %arg3[%c0_8, %c0_9], %9 {strides = array<i32>} : memref<1x256xf32, #tpu.memory_space<vmem>>, vector<1x256xf32>,
    return
  }
}

</mosaic_0001>

<bundles_post_ra>
// kernel: linear_planter_forward.1
= control target key start
LH: loop header
LB: loop body
LE: loop exit
PB: predicated region body
PF: predicated region fallthrough
CT: control target
= control target key end

     0   :  { %8 = vsyncpa [#allocation3], 0  ;;  %s441_s12 = smov [#allocation2]   ;;  %s495_s0 = inlined_call_operand.vmem [shape: bf16[1,256], index: 0, kind: input, shape index: {}]   ;;  %s496_s1 = inlined_call_operand.hbm [shape: bf16[256,256], index: 1, kind: input, shape index: {}]   ;;  %s497_s2 = inlined_call_operand.vmem [shape: f32[1,256], index: 2, kind: input, shape index: {}]   ;;  %s498_s3 = inlined_call_operand.vmem [shape: f32[1,256], index: 3, kind: output, shape index: {}]  }
   0x1   :  { %s16_s13 = sshll.u32 %s441_s12, 4  ;;  %s417_s16 = scalar_lea.hbm %s496_s1, 4096  ;;  %s17_s13 = int_to_ptr.vmem [resolvable:$true] %s16_s13 }
   0x2   :  { %p418_p0 = scmp.ne.s32.totalorder %s496_s1, %s417_s16  ;;  %p421_p1 = scmp.lt.u32.totalorder %s417_s16, %s496_s1 }
   0x4   :  { %p423_p2 = pnand %p421_p1, %p418_p0 }
   0x6   :  { %426 = shalt.err (!%p423_p2)
}
   0x7   :  { %s427_s21 = scalar_lea.vmem %s17_s13, 4096  ;;  %p432_p4 = scmp.lt.s32.totalorder %s17_s13, %s17_s13 }
   0x8   :  { %p428_p3 = scmp.ne.s32.totalorder %s17_s13, %s427_s21  ;;  %p433_p5 = scmp.lt.s32.totalorder %s427_s21, %s427_s21 }
   0xa   :  { %p434_p6 = por %p433_p5, %p432_p4 }
   0xc   :  { %p435_p7 = pnand %p434_p6, %p428_p3 }
   0xe   :  { %438 = shalt.err (!%p435_p7)
}
   0xf   :  { %s442_s22 = smov 128   ;;  %s443_s23 = smov 8  }
  0x10   :  { %22 = dma.hbm_to_vmem [thread:$0]  %s496_s1, 4096, %s17_s13, [#allocation3], %s442_s22, %s442_s22, %s443_s23  }
  0x11   :  { %439 = dma.done.wait [#allocation3], 4096  }
  0x12   :  { %440 = vsyncadd [#allocation3], 4294963200  ;;  %v369_v0 = vld [vmem:[#allocation2 + $0x4] ss:$8 sps:$4 sm:$0xff]   ;;  %v371_v1 = vld [vmem:[#allocation2] ss:$8 sps:$4 sm:$0xff]   ;;  %v74_v11 = vlaneseq }
  0x13   :  { %258 = vmatprep.subr.bf16.mxu0 %v369_v0  ;;  %v372_v2 = vld [vmem:[#allocation2 + $0x14] ss:$8 sps:$4 sm:$0xff]   ;;  %v374_v3 = vld [vmem:[#allocation2 + $0x10] ss:$8 sps:$4 sm:$0xff]   ;;  %v375_v4 = vld [vmem:[#allocation2 + $0x24] ss:$8 sps:$4 sm:$0xff]  }
  0x14   :  { %259 = vmatpush1.bf16.msra.mxu0 %v371_v1  ;;  %v377_v5 = vld [vmem:[#allocation2 + $0x20] ss:$8 sps:$4 sm:$0xff]   ;;  %v378_v6 = vld [vmem:[#allocation2 + $0x34] ss:$8 sps:$4 sm:$0xff]   ;;  %v380_v7 = vld [vmem:[#allocation2 + $0x30] ss:$8 sps:$4 sm:$0xff]  }
  0x15   :  { %260 = vmatprep.subr.bf16.mxu0 %v372_v2  ;;  %v381_v8 = vld [vmem:[#allocation2 + $0x44] ss:$8 sps:$4 sm:$0xff]   ;;  %v444_v9 = vmov 1966171168   ;;  %v383_v12 = vld [vmem:[#allocation2 + $0x40] ss:$8 sps:$4 sm:$0xff]  }
  0x16   :  { %v72_v10 = vunpack.c.l.s4 %v444_v9  ;;  %v384_v13 = vld [vmem:[#allocation2 + $0x54] ss:$8 sps:$4 sm:$0xff]   ;;  %v75_v15 = vshrl.u32 %v74_v11, 7  ;;  %v386_v16 = vld [vmem:[#allocation2 + $0x50] ss:$8 sps:$4 sm:$0xff]   ;;  %v445_v53 = vmov 0.0  }
  0x17   :  { %v387_v17 = vld [vmem:[#allocation2 + $0x64] ss:$8 sps:$4 sm:$0xff]   ;;  %v331_v19 = vld.sshfl [vmem:[%s495_s0] sm:$0x11 pattern:$0x75316420] }
  0x18   :  { %261 = vmatpush1.bf16.msra.mxu0 %v374_v3  ;;  %v73_v14 = vunpack.c.0.s8 %v72_v10  ;;  %v70_v20 = vcombine.high %v331_v19, %v331_v19  ;;  %v389_v21 = vld [vmem:[#allocation2 + $0x60] ss:$8 sps:$4 sm:$0xff]   ;;  %v390_v22 = vld [vmem:[#allocation2 + $0x74] ss:$8 sps:$4 sm:$0xff]   ;;  %v392_v24 = vld [vmem:[#allocation2 + $0x70] ss:$8 sps:$4 sm:$0xff]  }
  0x19   :  { %262 = vmatprep.subr.bf16.mxu0 %v375_v4  ;;  %v393_v25 = vld [vmem:[#allocation2 + $0x84] ss:$8 sps:$4 sm:$0xff]   ;;  %v395_v26 = vld [vmem:[#allocation2 + $0x80] ss:$8 sps:$4 sm:$0xff]   ;;  %v396_v27 = vld [vmem:[#allocation2 + $0x94] ss:$8 sps:$4 sm:$0xff]  }
  0x1a   :  { %v479_v18 = vsub.s32 %v73_v14, %v75_v15  ;;  %v398_v28 = vld [vmem:[#allocation2 + $0x90] ss:$8 sps:$4 sm:$0xff]   ;;  %v399_v29 = vld [vmem:[#allocation2 + $0xa4] ss:$8 sps:$4 sm:$0xff]   ;;  %v401_v30 = vld [vmem:[#allocation2 + $0xa0] ss:$8 sps:$4 sm:$0xff]  }
  0x1b   :  { %v402_v31 = vld [vmem:[#allocation2 + $0xb4] ss:$8 sps:$4 sm:$0xff]   ;;  %v404_v32 = vld [vmem:[#allocation2 + $0xb0] ss:$8 sps:$4 sm:$0xff]   ;;  %v405_v33 = vld [vmem:[#allocation2 + $0xc4] ss:$8 sps:$4 sm:$0xff]  }
  0x1c   :  { %263 = vmatpush1.bf16.msra.mxu0 %v377_v5  ;;  %v84_v23 = vrot.slane %v70_v20, %v479_v18  ;;  %v407_v34 = vld [vmem:[#allocation2 + $0xc0] ss:$8 sps:$4 sm:$0xff]   ;;  %v408_v35 = vld [vmem:[#allocation2 + $0xd4] ss:$8 sps:$4 sm:$0xff]   ;;  %v410_v36 = vld [vmem:[#allocation2 + $0xd0] ss:$8 sps:$4 sm:$0xff]   ;;  %v77_v41 = vrot.slane %v331_v19, %v479_v18 }
  0x1d   :  { %264 = vmatprep.subr.bf16.mxu0 %v378_v6  ;;  %v411_v37 = vld [vmem:[#allocation2 + $0xe4] ss:$8 sps:$4 sm:$0xff]   ;;  %v413_v38 = vld [vmem:[#allocation2 + $0xe0] ss:$8 sps:$4 sm:$0xff]   ;;  %v414_v39 = vld [vmem:[#allocation2 + $0xf4] ss:$8 sps:$4 sm:$0xff]  }
  0x1e   :  { %290 = vmatprep.mubr.bf16.mxu0 %v84_v23  ;;  %v416_v40 = vld [vmem:[#allocation2 + $0xf0] ss:$8 sps:$4 sm:$0xff]   ;;  %v250_v42 = vsub.s32 0, %v75_v15  ;;  %v61_v43 = vld [vmem:[%s497_s2] sm:$0x3]  ;;  %v254_v44 = vsub.s32 1, %v75_v15 }
  0x1f   :  { %vm323_vm2 = vcmp.lt.s32.totalorder %v74_v11, 256 }
  0x20   :  { %265 = vmatpush1.bf16.msra.mxu0 %v380_v7  ;;  %v251_v45 = vrot.slane %v61_v43, %v250_v42  ;;  %v255_v46 = vrot.slane %v61_v43, %v254_v44 }
  0x21   :  { %266 = vmatprep.subr.bf16.mxu0 %v381_v8 }
  0x24   :  { %267 = vmatpush1.bf16.msra.mxu0 %v383_v12 }
  0x25   :  { %268 = vmatprep.subr.bf16.mxu0 %v384_v13 }
  0x28   :  { %269 = vmatpush1.bf16.msra.mxu0 %v386_v16 }
  0x29   :  { %270 = vmatprep.subr.bf16.mxu0 %v387_v17 }
  0x2c   :  { %271 = vmatpush1.bf16.msra.mxu0 %v389_v21 }
  0x2d   :  { %272 = vmatprep.subr.bf16.mxu0 %v390_v22 }
  0x30   :  { %273 = vmatpush1.bf16.msra.mxu0 %v392_v24 }
  0x31   :  { %274 = vmatprep.subr.bf16.mxu0 %v393_v25 }
  0x34   :  { %275 = vmatpush1.bf16.msra.mxu0 %v395_v26 }
  0x35   :  { %276 = vmatprep.subr.bf16.mxu0 %v396_v27 }
  0x38   :  { %277 = vmatpush1.bf16.msra.mxu0 %v398_v28 }
  0x39   :  { %278 = vmatprep.subr.bf16.mxu0 %v399_v29 }
  0x3c   :  { %279 = vmatpush1.bf16.msra.mxu0 %v401_v30 }
  0x3d   :  { %280 = vmatprep.subr.bf16.mxu0 %v402_v31 }
  0x40   :  { %281 = vmatpush1.bf16.msra.mxu0 %v404_v32 }
  0x41   :  { %282 = vmatprep.subr.bf16.mxu0 %v405_v33 }
  0x44   :  { %283 = vmatpush1.bf16.msra.mxu0 %v407_v34 }
  0x45   :  { %284 = vmatprep.subr.bf16.mxu0 %v408_v35 }
  0x48   :  { %285 = vmatpush1.bf16.msra.mxu0 %v410_v36 }
  0x49   :  { %286 = vmatprep.subr.bf16.mxu0 %v411_v37 }
  0x4c   :  { %287 = vmatpush1.bf16.msra.mxu0 %v413_v38 }
  0x4d   :  { %288 = vmatprep.subr.bf16.mxu0 %v414_v39 }
  0x50   :  { %289 = vmatpush1.bf16.msra.mxu0 %v416_v40 }
  0x53   :  { %291 = vmatmul.mubr.bf16.vlgmr.msra.gmra.mrb[0].mxu0 %v77_v41 }
 0x126   :  { %v292_v47 = vpop.f32.mrb[0].mxu0 }
 0x127   :  { %v293_v48 = vadd.f32 %v292_v47, %v251_v45  ;;  %v294_v49 = vpop.f32.mrb[1].mxu0 }
 0x128   :  { %v295_v50 = vadd.f32 %v294_v49, %v255_v46  ;;  %v296_v51 = vpop.f32.mrb[2].mxu0 }
 0x129   :  { %vm299_vm0 = vcmp.gt.f32.partialorder %v293_v48, 0.0  ;;  %v297_v52 = vpop.f32.mrb[3].mxu0 }
 0x12a   :  { %v301_v54 = vsel %vm299_vm0, 1.0, %v445_v53  ;;  %vm300_vm1 = vcmp.gt.f32.partialorder %v295_v50, 0.0 }
 0x12b   :  { %v302_v55 = vsel %vm300_vm1, 1.0, %v445_v53 }
 0x12c   :  { %v305_v56 = vcombine.low %v301_v54, %v302_v55 }
 0x12e   :  { %v312_v57 = vrot.slane %v305_v56, %v479_v18 }
 0x130   :  { %v319_v58 = vrot.slane %v312_v57, %v479_v18 }
 0x132   :  { %325 = vst.msk [vmem:[%s498_s3] sm:$0x3] %vm323_vm2, %v319_v58 }
 0x133   :  { %330 = vsyncpa [#allocation3], 1 }

</bundles_post_ra>
